<compile_context>
chip_gen: v7x
topology: tpu7x:2x2x1
jax: 0.10.0
libtpu: 0.0.40
codegen_flags: <defaults>
</compile_context>

<pallas_src>
import functools
import math

import numpy as np
import jax
import jax.numpy as jnp
from jax import lax
from jax.experimental import pallas as pl
from jax.experimental.pallas import tpu as pltpu


# ----------------------------------------------------------------------------
# Kernel 1: fused  linear1 -> Sine -> linear2   (one row tile per grid step)
# ----------------------------------------------------------------------------
def _fused_mlp_kernel(x_ref, w1_ref, b1_ref, w2_ref, b2_ref, o_ref, *, w0):
    h = jnp.dot(x_ref[...], w1_ref[...], preferred_element_type=jnp.float32)
    h = jnp.sin(w0 * (h + b1_ref[...]))
    y = jnp.dot(h, w2_ref[...], preferred_element_type=jnp.float32) + b2_ref[...]
    o_ref[...] = y.astype(o_ref.dtype)


def fused_mlp(x, w1, b1, w2, b2, *, w0=1.0):
    m, indim = x.shape
    hidden = w1.shape[1]
    outdim = w2.shape[1]
    mp = ((m + 7) // 8) * 8                       # pad rows to sublane multiple
    if mp != m:
        x = jnp.pad(x, ((0, mp - m), (0, 0)))
    if mp <= 256:
        tm = mp
    else:
        tm = next(t for t in (256, 128, 64, 32, 16, 8) if mp % t == 0)
    out = pl.pallas_call(
        functools.partial(_fused_mlp_kernel, w0=w0),
        out_shape=jax.ShapeDtypeStruct((mp, outdim), x.dtype),
        grid=(mp // tm,),
        in_specs=[
            pl.BlockSpec((tm, indim), lambda i: (i, 0)),
            pl.BlockSpec((indim, hidden), lambda i: (0, 0)),
            pl.BlockSpec((1, hidden), lambda i: (0, 0)),
            pl.BlockSpec((hidden, outdim), lambda i: (0, 0)),
            pl.BlockSpec((1, outdim), lambda i: (0, 0)),
        ],
        out_specs=pl.BlockSpec((tm, outdim), lambda i: (i, 0)),
        compiler_params=pltpu.CompilerParams(dimension_semantics=("parallel",)),
    )(x, w1, b1.reshape(1, hidden), w2, b2.reshape(1, outdim))
    return out[:m]


# ----------------------------------------------------------------------------
# Kernel 2: 3x3 conv as a lane-dense matmul over im2col patches,
#           fused bias add (+ optional Sine activation).
# ----------------------------------------------------------------------------
def _conv_mm_kernel(p_ref, w_ref, b_ref, o_ref, *, w0, apply_sine):
    y = jnp.dot(w_ref[...], p_ref[...], preferred_element_type=jnp.float32)
    y = y + b_ref[...]
    if apply_sine:
        y = jnp.sin(w0 * y)
    o_ref[...] = y.astype(o_ref.dtype)


def _pick_col_tile(s):
    """Largest lane-dense column tile (multiple of 128) that divides s."""
    if s <= 512:
        return s
    for cand in (1024, 512, 256, 128):
        if s % cand == 0:
            return cand
    return s


def _im2col_3x3(x_nchw):
    # TODO(synk): wrapper-side layout plumbing (pure index shuffle); an
    # in-kernel shift-and-matmul accumulation would avoid the 9x expansion.
    n, c, h, w = x_nchw.shape
    xp = jnp.pad(x_nchw, ((0, 0), (0, 0), (1, 1), (1, 1)))
    taps = [xp[:, :, dy:dy + h, dx:dx + w] for dy in range(3) for dx in range(3)]
    p = jnp.stack(taps, axis=0)                        # (9, n, c, h, w)
    p = p.transpose(0, 2, 1, 3, 4).reshape(9 * c, n * h * w)
    return p


def conv3x3(x_nchw, weight, bias, *, w0=1.0, apply_sine=True):
    n, cin, h, w = x_nchw.shape
    cout = weight.shape[0]
    s = n * h * w                                      # lane-dense spatial axis
    kdim = 9 * cin
    p = _im2col_3x3(x_nchw)                            # (9*Cin, N*H*W)
    wmat = weight.transpose(0, 2, 3, 1).reshape(cout, kdim)
    b2d = bias.reshape(cout, 1)
    ts = _pick_col_tile(s)
    out = pl.pallas_call(
        functools.partial(_conv_mm_kernel, w0=w0, apply_sine=apply_sine),
        out_shape=jax.ShapeDtypeStruct((cout, s), x_nchw.dtype),
        grid=(s // ts,),
        in_specs=[
            pl.BlockSpec((kdim, ts), lambda j: (0, j)),
            pl.BlockSpec((cout, kdim), lambda j: (0, 0)),
            pl.BlockSpec((cout, 1), lambda j: (0, 0)),
        ],
        out_specs=pl.BlockSpec((cout, ts), lambda j: (0, j)),
        compiler_params=pltpu.CompilerParams(dimension_semantics=("parallel",)),
    )(p, wmat, b2d)
    return out.reshape(cout, n, h, w).transpose(1, 0, 2, 3)


def upsample2x_nearest(x_nchw):
    # TODO(synk): pure index replication; kept wrapper-side (layout plumbing).
    return jnp.repeat(jnp.repeat(x_nchw, 2, axis=2), 2, axis=3)


# ----------------------------------------------------------------------------
# Module
# ----------------------------------------------------------------------------
class ConvRecover:
    """JAX/Pallas port of the PyTorch `conv_recover` module (default path)."""

    def __init__(self, topk_num, ch, resolution, start_reso=4, minimal_ch=16,
                 w0=1.0, key=None, dtype=jnp.float32):
        self.ch = ch
        self.interm_ch = max(1, ch // 2)
        self.one_vc_ch = max(self.interm_ch // topk_num, minimal_ch)
        self.resolution = resolution
        self.start_reso = start_reso
        self.topk_num = topk_num
        self.w0 = w0
        end_rb = int(math.log2(resolution))
        start_rb = int(math.log2(start_reso))
        num_blocks = end_rb - start_rb
        self.conv_chs = [self.one_vc_ch // 2 ** i
                         for i in range(num_blocks, 0, -1)] + [self.one_vc_ch]
        self.linear_indim = ch + resolution + resolution
        self.linear_outdim = start_reso * start_reso * self.conv_chs[0]
        self.linear_hidden_dim = self.linear_outdim

        if key is None:
            key = jax.random.PRNGKey(0)
        keys = iter(jax.random.split(key, 4 + 2 * (num_blocks + 1)))

        def _dense(k_, fan_in, shape):
            return jax.random.normal(k_, shape, dtype) / np.sqrt(fan_in)

        self.w1 = _dense(next(keys), self.linear_indim,
                         (self.linear_indim, self.linear_hidden_dim))
        self.b1 = 0.1 * jax.random.normal(next(keys), (self.linear_hidden_dim,), dtype)
        self.w2 = _dense(next(keys), self.linear_hidden_dim,
                         (self.linear_hidden_dim, self.linear_outdim))
        self.b2 = 0.1 * jax.random.normal(next(keys), (self.linear_outdim,), dtype)

        self.conv_params = []
        for i in range(num_blocks):
            cin, cout = self.conv_chs[i], self.conv_chs[i + 1]
            wgt = _dense(next(keys), 9 * cin, (cout, cin, 3, 3))
            b = 0.1 * jax.random.normal(next(keys), (cout,), dtype)
            self.conv_params.append((wgt, b))
        cin_last = self.topk_num * self.conv_chs[-1]
        self.w_last = _dense(next(keys), 9 * cin_last, (self.ch, cin_last, 3, 3))
        self.b_last = 0.1 * jax.random.normal(next(keys), (self.ch,), dtype)

    def __call__(self, x, x_position, y_position, class_info=None):
        """x: [n,k,c], x_position: [n,k,resolution], y_position: [n,k,resolution]."""
        if class_info is not None:
            # TODO(synk): class_conditional_module path not ported.
            raise NotImplementedError("class-conditional path not ported")
        n, k, _ = x.shape
        h = jnp.concatenate([x, x_position, y_position], axis=2).reshape(n * k, -1)
        h = fused_mlp(h, self.w1, self.b1, self.w2, self.b2, w0=self.w0)
        h = h.reshape(n * k, self.conv_chs[0], self.start_reso, self.start_reso)
        for wgt, b in self.conv_params:
            h = upsample2x_nearest(h)
            h = conv3x3(h, wgt, b, w0=self.w0, apply_sine=True)
        h = h.reshape(n, k * self.one_vc_ch, self.resolution, self.resolution)
        out = conv3x3(h, self.w_last, self.b_last, apply_sine=False)
        # TODO(synk): mask_reconstruct (spatial-softmax mask) path not ported.
        return out, None


# ----------------------------------------------------------------------------
# Pure-JAX reference (XLA ops) for correctness checking
# ----------------------------------------------------------------------------
def _reference_forward(module, x, x_position, y_position):
    hp = jax.lax.Precision.HIGHEST
    n, k, _ = x.shape
    h = jnp.concatenate([x, x_position, y_position], axis=2).reshape(n * k, -1)
    h = jnp.sin(module.w0 * (jnp.dot(h, module.w1, precision=hp) + module.b1))
    h = jnp.dot(h, module.w2, precision=hp) + module.b2
    h = h.reshape(n * k, module.conv_chs[0], module.start_reso, module.start_reso)
    for wgt, b in module.conv_params:
        h = jnp.repeat(jnp.repeat(h, 2, axis=2), 2, axis=3)
        h = lax.conv_general_dilated(h, wgt, (1, 1), "SAME",
                                     dimension_numbers=("NCHW", "OIHW", "NCHW"),
                                     precision=hp)
        h = jnp.sin(module.w0 * (h + b[None, :, None, None]))
    h = h.reshape(n, k * module.one_vc_ch, module.resolution, module.resolution)
    out = lax.conv_general_dilated(h, module.w_last, (1, 1), "SAME",
                                   dimension_numbers=("NCHW", "OIHW", "NCHW"),
                                   precision=hp)
    return out + module.b_last[None, :, None, None]


if __name__ == "__main__":
    key = jax.random.PRNGKey(0)
    k_params, k_x, k_xp, k_yp = jax.random.split(key, 4)

    n, topk_num, ch, resolution, start_reso = 2, 4, 32, 16, 4
    module = ConvRecover(topk_num=topk_num, ch=ch, resolution=resolution,
                         start_reso=start_reso, key=k_params)

    x = jax.random.normal(k_x, (n, topk_num, ch), dtype=jnp.float32)
    x_position = jax.random.normal(k_xp, (n, topk_num, resolution), dtype=jnp.float32)
    y_position = jax.random.normal(k_yp, (n, topk_num, resolution), dtype=jnp.float32)

    out, mask = module(x, x_position, y_position)
    jax.block_until_ready(out)
    assert out.shape == (n, ch, resolution, resolution)
    assert mask is None

    ref = _reference_forward(module, x, x_position, y_position)
    np.testing.assert_allclose(np.asarray(out), np.asarray(ref),
                               rtol=2e-2, atol=2e-2)

    print("KERNEL_OK")
</pallas_src>

<mosaic_0001>
module attributes {stable_mosaic.version = 11 : i64} {
  func.func @_fused_mlp_kernel(%arg0: i32, %arg1: memref<8x64xf32, #tpu.memory_space<vmem>>, %arg2: memref<64x64xf32, #tpu.memory_space<vmem>>, %arg3: memref<1x64xf32, #tpu.memory_space<vmem>>, %arg4: memref<64x64xf32, #tpu.memory_space<vmem>>, %arg5: memref<1x64xf32, #tpu.memory_space<vmem>>, %arg6: memref<8x64xf32, #tpu.memory_space<vmem>>) attributes {dimension_semantics = [#tpu.dimension_semantics<parallel>], iteration_bounds = array<i64: 1>, scalar_prefetch = 0 : i64, scratch_operands = 0 : i64, tpu.core_type = #tpu.core_type<tc>, window_params = [{transform_indices = @transform_0, window_bounds = array<i64: 8, 64>}, {pipeline_mode = #tpu.pipeline_mode<synchronous>, transform_indices = @transform_1, window_bounds = array<i64: 64, 64>}, {pipeline_mode = #tpu.pipeline_mode<synchronous>, transform_indices = @transform_2, window_bounds = array<i64: 1, 64>}, {pipeline_mode = #tpu.pipeline_mode<synchronous>, transform_indices = @transform_3, window_bounds = array<i64: 64, 64>}, {pipeline_mode = #tpu.pipeline_mode<synchronous>, transform_indices = @transform_4, window_bounds = array<i64: 1, 64>}, {transform_indices = @transform_5, window_bounds = array<i64: 8, 64>}]} {
    %c0 = arith.constant 0 : index
    %c0_0 = arith.constant 0 : index
    %0 = vector.load %arg1[%c0, %c0_0] : memref<8x64xf32, #tpu.memory_space<vmem>>, vector<8x64xf32>
    %c0_1 = arith.constant 0 : index
    %c0_2 = arith.constant 0 : index
    %1 = vector.load %arg2[%c0_1, %c0_2] : memref<64x64xf32, #tpu.memory_space<vmem>>, vector<64x64xf32>
    %cst = arith.constant dense<0.000000e+00> : vector<8x64xf32>
    %2 = tpu.matmul %0, %1, %cst {dimension_numbers = #tpu.dot_dimension_numbers<[1], [0], [0], [1], [0, 0, 1, 1], [], []>} : vector<8x64xf32>, vector<64x64xf32>, vector<8x64xf32> -> vector<8x64xf32>
    %c0_3 = arith.constant 0 : index
    %c0_4 = arith.constant 0 : index
    %3 = vector.load %arg3[%c0_3, %c0_4] : memref<1x64xf32, #tpu.memory_space<vmem>>, vector<1x64xf32>
    %4 = vector.broadcast %3 : vector<1x64xf32> to vector<8x64xf32>
    %5 = arith.addf %2, %4 : vector<8x64xf32>
    %cst_5 = arith.constant 1.000000e+00 : f32
    %6 = vector.broadcast %cst_5 : f32 to vector<8x64xf32>
    %7 = arith.mulf %6, %5 : vector<8x64xf32>
    %8 = math.sin %7 : vector<8x64xf32>
    %c0_6 = arith.constant 0 : index
    %c0_7 = arith.constant 0 : index
    %9 = vector.load %arg4[%c0_6, %c0_7] : memref<64x64xf32, #tpu.memory_space<vmem>>, vector<64x64xf32>
    %cst_8 = arith.constant dense<0.000000e+00> : vector<8x64xf32>
    %10 = tpu.matmul %8, %9, %cst_8 {dimension_numbers = #tpu.dot_dimension_numbers<[1], [0], [0], [1], [0, 0, 1, 1], [], []>} : vector<8x64xf32>, vector<64x64xf32>, vector<8x64xf32> -> vector<8x64xf32>
    %c0_9 = arith.constant 0 : index
    %c0_10 = arith.constant 0 : index
    %11 = vector.load %arg5[%c0_9, %c0_10] : memref<1x64xf32, #tpu.memory_space<vmem>>, vector<1x64xf32>
    %12 = vector.broadcast %11 : vector<1x64xf32> to vector<8x64xf32>
    %13 = arith.addf %10, %12 : vector<8x64xf32>
    %c0_11 = arith.constant 0 : index
    %c0_12 = arith.constant 0 : index
    %14 = vector.load %arg6[%c0_11, %c0_12] : memref<8x64xf32, #tpu.memory_space<vmem>>, vector<8x64xf32>
    tpu.vector_store %arg6[%c0_11, %c0_12], %13 {strides = array<i32>} : memref<8x64xf32, #tpu.memory_space<vmem>>, vector<8x64xf32>,
    return
  }
  func.func @transform_0(%arg0: i32) -> (i32, i32) {
    %c0_i32 = arith.constant 0 : i32
    %c0_i32_0 = arith.constant 0 : i32
    return %arg0, %c0_i32 : i32, i32
  }
  func.func @transform_1(%arg0: i32) -> (i32, i32) {
    %c0_i32 = arith.constant 0 : i32
    %c0_i32_0 = arith.constant 0 : i32
    %c0_i32_1 = arith.constant 0 : i32
    return %c0_i32, %c0_i32_0 : i32, i32
  }
  func.func @transform_2(%arg0: i32) -> (i32, i32) {
    %c0_i32 = arith.constant 0 : i32
    %c0_i32_0 = arith.constant 0 : i32
    %c0_i32_1 = arith.constant 0 : i32
    return %c0_i32, %c0_i32_0 : i32, i32
  }
  func.func @transform_3(%arg0: i32) -> (i32, i32) {
    %c0_i32 = arith.constant 0 : i32
    %c0_i32_0 = arith.constant 0 : i32
    %c0_i32_1 = arith.constant 0 : i32
    return %c0_i32, %c0_i32_0 : i32, i32
  }
  func.func @transform_4(%arg0: i32) -> (i32, i32) {
    %c0_i32 = arith.constant 0 : i32
    %c0_i32_0 = arith.constant 0 : i32
    %c0_i32_1 = arith.constant 0 : i32
    return %c0_i32, %c0_i32_0 : i32, i32
  }
  func.func @transform_5(%arg0: i32) -> (i32, i32) {
    %c0_i32 = arith.constant 0 : i32
    %c0_i32_0 = arith.constant 0 : i32
    return %arg0, %c0_i32 : i32, i32
  }
}

</mosaic_0001>

<bundles_post_ra>
// kernel: tpu_custom_call.1
= control target key start
LH: loop header
LB: loop body
LE: loop exit
PB: predicated region body
PF: predicated region fallthrough
CT: control target
= control target key end

     0   :  { %10 = vsyncpa [#allocation3], 0  ;;  %s693_s0 = inlined_call_operand.hbm [shape: f32[8,64], index: 0, kind: input, shape index: {}]   ;;  %s694_s1 = inlined_call_operand.hbm [shape: f32[64,64], index: 1, kind: input, shape index: {}]   ;;  %s695_s2 = inlined_call_operand.vmem [shape: f32[1,64], index: 2, kind: input, shape index: {}]   ;;  %s696_s3 = inlined_call_operand.hbm [shape: f32[64,64], index: 3, kind: input, shape index: {}]   ;;  %s697_s4 = inlined_call_operand.vmem [shape: f32[1,64], index: 4, kind: input, shape index: {}]   ;;  %s698_s5 = inlined_call_operand.hbm [shape: f32[8,64], index: 5, kind: output, shape index: {}]  }
   0x1   :  { %11 = vsyncpa [#allocation6], 0 }
   0x2   :  { %12 = vsyncpa [#allocation4], 0  ;;  %s564_s18 = smov [#allocation5]   ;;  %s470_s22 = scalar_lea.hbm %s694_s1, 1024 }
   0x3   :  { %s28_s19 = sshll.u32 %s564_s18, 4  ;;  %p471_p0 = scmp.ne.s32.totalorder %s694_s1, %s470_s22  ;;  %s29_s19 = int_to_ptr.vmem [resolvable:$true] %s28_s19 }
   0x4   :  { %p474_p1 = scmp.lt.u32.totalorder %s470_s22, %s694_s1 }
   0x6   :  { %p476_p2 = pnand %p474_p1, %p471_p0 }
   0x8   :  { %479 = shalt.err (!%p476_p2)
}
   0x9   :  { %s480_s27 = scalar_lea.vmem %s29_s19, 1024  ;;  %p485_p4 = scmp.lt.s32.totalorder %s29_s19, %s29_s19 }
   0xa   :  { %p481_p3 = scmp.ne.s32.totalorder %s29_s19, %s480_s27  ;;  %p486_p5 = scmp.lt.s32.totalorder %s480_s27, %s480_s27 }
   0xc   :  { %p487_p6 = por %p486_p5, %p485_p4 }
   0xe   :  { %p488_p7 = pnand %p487_p6, %p481_p3 }
  0x10   :  { %491 = shalt.err (!%p488_p7)
}
  0x11   :  { %s565_s28 = smov 128   ;;  %s566_s29 = smov 8  }
  0x12   :  { %34 = dma.hbm_to_vmem [thread:$0]  %s694_s1, 1024, %s29_s19, [#allocation6], %s565_s28, %s565_s28, %s566_s29  }
  0x13   :  { %s567_s7 = smov [#allocation2]   ;;  %s568_s9 = smov [#allocation7]  }
  0x14   :  { %s19_s8 = sshll.u32 %s567_s7, 4  ;;  %s42_s10 = sshll.u32 %s568_s9, 4  ;;  %s20_s8 = int_to_ptr.vmem [resolvable:$true] %s19_s8  ;;  %s43_s10 = int_to_ptr.vmem [resolvable:$true] %s42_s10 }
  0x15   :  { %s492_s13 = scalar_lea.hbm %s693_s0, 128 }
  0x16   :  { %p493_p8 = scmp.ne.s32.totalorder %s693_s0, %s492_s13  ;;  %p496_p9 = scmp.lt.u32.totalorder %s492_s13, %s693_s0 }
  0x18   :  { %p498_p10 = pnand %p496_p9, %p493_p8 }
  0x1a   :  { %501 = shalt.err (!%p498_p10)
}
  0x1b   :  { %s502_s1 = scalar_lea.vmem %s20_s8, 128  ;;  %p507_p12 = scmp.lt.s32.totalorder %s20_s8, %s20_s8 }
  0x1c   :  { %p503_p11 = scmp.ne.s32.totalorder %s20_s8, %s502_s1  ;;  %p508_p13 = scmp.lt.s32.totalorder %s502_s1, %s502_s1 }
  0x1e   :  { %p509_p0 = por %p508_p13, %p507_p12 }
  0x20   :  { %p510_p1 = pnand %p509_p0, %p503_p11 }
  0x22   :  { %513 = shalt.err (!%p510_p1)
}
  0x23   :  { %22 = dma.hbm_to_vmem [thread:$0]  %s693_s0, 128, %s20_s8, [#allocation3]  }
  0x24   :  { %s514_s22 = scalar_lea.hbm %s696_s3, 1024 }
  0x25   :  { %p515_p2 = scmp.ne.s32.totalorder %s696_s3, %s514_s22  ;;  %p518_p3 = scmp.lt.u32.totalorder %s514_s22, %s696_s3 }
  0x27   :  { %p520_p4 = pnand %p518_p3, %p515_p2 }
  0x29   :  { %523 = shalt.err (!%p520_p4)
}
  0x2a   :  { %s524_s27 = scalar_lea.vmem %s43_s10, 1024  ;;  %p529_p6 = scmp.lt.s32.totalorder %s43_s10, %s43_s10 }
  0x2b   :  { %p525_p5 = scmp.ne.s32.totalorder %s43_s10, %s524_s27  ;;  %p530_p7 = scmp.lt.s32.totalorder %s524_s27, %s524_s27 }
  0x2d   :  { %p531_p8 = por %p530_p7, %p529_p6 }
  0x2f   :  { %p532_p9 = pnand %p531_p8, %p525_p5 }
  0x31   :  { %535 = shalt.err (!%p532_p9)
}
  0x32   :  { %48 = dma.hbm_to_vmem [thread:$0]  %s696_s3, 1024, %s43_s10, [#allocation6], %s565_s28, %s565_s28, %s566_s29  }
  0x33   :  { %558 = dma.done.wait [#allocation3], 128  }
  0x34   :  { %559 = vsyncadd [#allocation3], 4294967168 }
  0x35   :  { %560 = dma.done.wait [#allocation6], 2048  }
  0x36   :  { %561 = vsyncadd [#allocation6], 4294965248  ;;  %v569_v0 = vmov 0.0|0.0   ;;  %vm570_vm0 = vmmov 0   ;;  %v571_v1 = vmov 0.0   ;;  %v61_v2 = vld [vmem:[#allocation5] sm:$0xff] }
  0x37   :  { %423 = vmatprep.subr.bf16.mxu0 %v569_v0  ;;  %401 = vmatprep.mubr.msk.f32.mxu0 %vm570_vm0, %v571_v1  ;;  %v62_v3 = vld [vmem:[#allocation5 + $0x8] sm:$0xff]  ;;  %v63_v4 = vld [vmem:[#allocation5 + $0x10] sm:$0xff]  ;;  %v64_v6 = vld [vmem:[#allocation5 + $0x18] sm:$0xff]  ;;  %vm76_vm1 = vcmask 523264   ;;  %v572_v41 = vmov 683565275  }
  0x38   :  { %435 = vmatprep.subr.bf16.mxu1 %v569_v0  ;;  %420 = vmatprep.mubr.msk.f32.mxu1 %vm570_vm0, %v571_v1  ;;  %v424_v5 = vpack.c.bf16 %v62_v3, %v61_v2  ;;  %v427_v7 = vpack.c.bf16 %v64_v6, %v63_v4  ;;  %v65_v8 = vld [vmem:[#allocation5 + $0x20] sm:$0xff]  ;;  %v66_v9 = vld [vmem:[#allocation5 + $0x28] sm:$0xff]  ;;  %v67_v11 = vld [vmem:[#allocation5 + $0x30] sm:$0xff]  ;;  %v573_v43 = vmov 2475754826   ;;  %s578_s6 = smov [#allocation8]  }
  0x39   :  { %v430_v10 = vpack.c.bf16 %v66_v9, %v65_v8  ;;  %v68_v12 = vld [vmem:[#allocation5 + $0x38] sm:$0xff]  ;;  %v254_v15 = vld [vmem:[#allocation7] sm:$0xff]  ;;  %v255_v16 = vld [vmem:[#allocation7 + $0x8] sm:$0xff]  ;;  %v574_v46 = vmov 2131351028   ;;  %s349_s7 = sshll.u32 %s578_s6, 4  ;;  %s350_s7 = int_to_ptr.vmem [resolvable:$true] %s349_s7 }
  0x3a   :  { %425 = vmatpush3.bf16.msra.mxu0 %v424_v5  ;;  %v433_v13 = vpack.c.bf16 %v68_v12, %v67_v11  ;;  %v60_v14 = vld [vmem:[#allocation2] sm:$0xff]  ;;  %v436_v17 = vpack.c.bf16 %v255_v16, %v254_v15  ;;  %v256_v18 = vld [vmem:[#allocation7 + $0x10] sm:$0xff]  ;;  %v258_v21 = vld [vmem:[#allocation7 + $0x20] sm:$0xff]  ;;  %v575_v49 = vmov 2102212464   ;;  %s536_s8 = scalar_lea.vmem %s350_s7, 128  ;;  %p541_p11 = scmp.lt.s32.totalorder %s350_s7, %s350_s7 }
  0x3b   :  { %426 = vmatprep.subr.bf16.mxu0 %v569_v0  ;;  %v257_v19 = vld [vmem:[#allocation7 + $0x18] sm:$0xff]  ;;  %v259_v22 = vld [vmem:[#allocation7 + $0x28] sm:$0xff]  ;;  %v260_v24 = vld [vmem:[#allocation7 + $0x30] sm:$0xff]  ;;  %v576_v52 = vmov 920167782   ;;  %p537_p10 = scmp.ne.s32.totalorder %s350_s7, %s536_s8  ;;  %p542_p12 = scmp.lt.s32.totalorder %s536_s8, %s536_s8 }
  0x3c   :  { %437 = vmatpush3.bf16.msra.mxu1 %v436_v17  ;;  %v439_v20 = vpack.c.bf16 %v257_v19, %v256_v18  ;;  %v442_v23 = vpack.c.bf16 %v259_v22, %v258_v21  ;;  %v261_v25 = vld [vmem:[#allocation7 + $0x38] sm:$0xff]  ;;  %v577_v55 = vmov 1326507024  }
  0x3d   :  { %438 = vmatprep.subr.bf16.mxu1 %v569_v0  ;;  %v445_v26 = vpack.c.bf16 %v261_v25, %v260_v24  ;;  %v359_v27 = vld [vmem:[%s695_s2] ss:$0 sm:$0xff]  ;;  %p543_p13 = por %p542_p12, %p541_p11 }
  0x3e   :  { %428 = vmatpush3.bf16.msra.mxu0 %v427_v7 }
  0x3f   :  { %429 = vmatprep.subr.bf16.mxu0 %v569_v0  ;;  %p544_p0 = pnand %p543_p13, %p537_p10 }
  0x40   :  { %440 = vmatpush3.bf16.msra.mxu1 %v439_v20 }
  0x41   :  { %441 = vmatprep.subr.bf16.mxu1 %v569_v0 }
  0x42   :  { %431 = vmatpush3.bf16.msra.mxu0 %v430_v10 }
  0x43   :  { %432 = vmatprep.subr.bf16.mxu0 %v569_v0 }
  0x44   :  { %443 = vmatpush3.bf16.msra.mxu1 %v442_v23 }
  0x45   :  { %444 = vmatprep.subr.bf16.mxu1 %v569_v0 }
  0x46   :  { %434 = vmatpush3.bf16.msra.mxu0 %v433_v13 }
  0x48   :  { %446 = vmatpush3.bf16.msra.mxu1 %v445_v26 }
  0x49   :  { %402 = vmatmul.mubr.msk.f32.vlgmr.msra.gmra.mrb[0].mxu0 %vm76_vm1, %v60_v14 }
 0x11c   :  { %v146_v28 = vpop.f32.mrb[0].mxu0 }
 0x11d   :  { %v655_v29 = vadd.f32 %v359_v27, %v146_v28  ;;  %v403_v30 = vpop.f32.mrb[1].mxu0 }
 0x11f   :  { %v153_v31 = vand.u32 2139095040, %v655_v29  ;;  %v150_v35 = vand.u32 2147483647, %v655_v29  ;;  %vm152_vm9 = vcmp.lt.s32.totalorder %v655_v29, 0  ;;  %vm242_vm14 = vweird.f32 %v655_v29 }
 0x121   :  { %v154_v32 = vshrl.u32 %v153_v31, 23  ;;  %v157_v38 = vand.u32 8388607, %v150_v35  ;;  %vm151_vm10 = vcmp.le.f32.partialorder %v150_v35, 0.7853982 }
 0x123   :  { %v361_v33 = vadd.s32 4294967169, %v154_v32  ;;  %v158_v57 = vor.u32 8388608, %v157_v38 }
 0x125   :  { %v160_v34 = vadd.s32 1, %v361_v33  ;;  %v198_v7 = vshll.u32 %v158_v57, 8 }
 0x127   :  { %vm161_vm2 = vcmp.gt.s32.totalorder %v160_v34, 0 }
 0x128   :  { %v162_v36 = vsel %vm161_vm2, %v160_v34, 0 }
 0x129   :  { %v164_v37 = vand.u32 31, %v162_v36  ;;  %v163_v40 = vshrl.u32 %v162_v36, 5 }
 0x12b   :  { %v165_v39 = vsub.s32 32, %v164_v37  ;;  %v167_v42 = vshll.u32 %v572_v41, %v164_v37  ;;  %v170_v44 = vshll.u32 %v573_v43, %v164_v37  ;;  %v173_v48 = vshll.u32 %v574_v46, %v164_v37 }
 0x12c   :  { %v176_v51 = vshll.u32 %v575_v49, %v164_v37  ;;  %v179_v54 = vshll.u32 %v576_v52, %v164_v37  ;;  %vm182_vm3 = vcmp.lt.s32.totalorder %v163_v40, 1  ;;  %vm185_vm4 = vcmp.lt.s32.totalorder %v163_v40, 4 }
 0x12d   :  { %v168_v45 = vshrl.u32 %v573_v43, %v165_v39  ;;  %v171_v47 = vshrl.u32 %v574_v46, %v165_v39  ;;  %v174_v50 = vshrl.u32 %v575_v49, %v165_v39  ;;  %v177_v53 = vshrl.u32 %v576_v52, %v165_v39 }
 0x12e   :  { %v180_v56 = vshrl.u32 %v577_v55, %v165_v39  ;;  %v166_v2 = vshrl.u32 %v572_v41, %v165_v39  ;;  %vm184_vm5 = vcmp.lt.s32.totalorder %v163_v40, 3  ;;  %vm183_vm6 = vcmp.lt.s32.totalorder %v163_v40, 2 }
 0x12f   :  { %v169_v58 = vor.u32 %v168_v45, %v167_v42  ;;  %v172_v59 = vor.u32 %v171_v47, %v170_v44  ;;  %v175_v60 = vor.u32 %v174_v50, %v173_v48  ;;  %v178_v61 = vor.u32 %v177_v53, %v176_v51 }
 0x130   :  { %v181_v62 = vor.u32 %v180_v56, %v179_v54 }
 0x131   :  { %v187_v63 = vsel %vm185_vm4, %v175_v60, 2102212464  ;;  %v190_v0 = vsel %vm182_vm3, %v169_v58, %v172_v59  ;;  %v194_v1 = vsel %vm182_vm3, %v172_v59, %v175_v60  ;;  %v191_v3 = vsel %vm185_vm4, %v178_v61, 920167782 }
 0x132   :  { %v195_v4 = vsel %vm185_vm4, %v181_v62, 1326507024  ;;  %v192_v5 = vsel %vm184_vm5, %v175_v60, %v191_v3  ;;  %v186_v8 = vsel %vm182_vm3, %v166_v2, %v169_v58  ;;  %v188_v9 = vsel %vm184_vm5, %v172_v59, %v187_v63  ;;  %v365_v59 = vld [vmem:[%s697_s4] ss:$0 sm:$0xff] }
 0x133   :  { %v196_v6 = vsel %vm184_vm5, %v178_v61, %v195_v4  ;;  %v193_v10 = vsel %vm183_vm6, %v190_v0, %v192_v5  ;;  %v189_v16 = vsel %vm183_vm6, %v186_v8, %v188_v9 }
 0x134   :  { %v197_v11 = vsel %vm183_vm6, %v194_v1, %v196_v6  ;;  %v664_v14 = vmul.u32.u64.low %v198_v7, %v193_v10  ;;  %v665_v15 = vmul.u32.u64.high %v198_v7, %v193_v10, %v664_v14  ;;  %v205_v18 = vmul.u32 %v198_v7, %v189_v16 }
 0x135   :  { %v661_v12 = vmul.u32.u64.low %v198_v7, %v197_v11  ;;  %v662_v13 = vmul.u32.u64.high %v198_v7, %v197_v11, %v661_v12 }
 0x136   :  { %v208_v17 = vadd.s32 1, %v665_v15 }
 0x137   :  { %vm207_vm7 = vc.u32 %v662_v13, %v664_v14  ;;  %v206_v31 = vadd.s32 %v664_v14, %v662_v13 }
 0x138   :  { %v209_v19 = vsel %vm207_vm7, %v208_v17, %v665_v15 }
 0x139   :  { %v210_v20 = vadd.s32 %v209_v19, %v205_v18 }
 0x13b   :  { %v211_v21 = vadd.s32 536870912, %v210_v20 }
 0x13d   :  { %v212_v22 = vshrl.u32 %v211_v21, 30 }
 0x13f   :  { %v213_v23 = vshll.u32 %v212_v22, 30  ;;  %v236_v44 = vsub.s32 4, %v212_v22 }
 0x141   :  { %v214_v24 = vsub.s32 %v210_v20, %v213_v23  ;;  %v237_v47 = vsel %vm152_vm9, %v236_v44, %v212_v22 }
 0x142   :  { %v239_v49 = vsel %vm151_vm10, 0, %v237_v47 }
 0x143   :  { %v216_v25 = vsub.s32 0, %v214_v24  ;;  %v243_v50 = vadd.s32 3, %v239_v49 }
 0x145   :  { %v362_v26 = vmin.u32 %v216_v25, %v214_v24  ;;  %v244_v51 = vand.u32 3, %v243_v50 }
 0x147   :  { %v218_v27 = vclz %v362_v26  ;;  %vm249_vm11 = vcmp.eq.s32.totalorder %v244_v51, 2  ;;  %vm246_vm12 = vcmp.eq.s32.totalorder %v244_v51, 0  ;;  %vm245_vm13 = vcmp.lt.s32.totalorder %v244_v51, 2 }
 0x149   :  { %v363_v28 = vadd.s32 4294967294, %v218_v27 }
 0x14b   :  { %vm364_vm8 = vcmp.lt.s32.totalorder %v363_v28, 0 }
 0x14c   :  { %v221_v30 = vsel %vm364_vm8, 0, %v363_v28 }
 0x14d   :  { %v222_v32 = vsub.s32 32, %v221_v30  ;;  %v226_v33 = vsub.s32 4294967266, %v221_v30  ;;  %v223_v34 = vshll.u32 %v214_v24, %v221_v30 }
 0x14f   :  { %v224_v36 = vshrl.u32 %v206_v31, %v222_v32  ;;  %v227_v37 = vadd.s32 127, %v226_v33 }
 0x151   :  { %v225_v38 = vor.u32 %v224_v36, %v223_v34  ;;  %v228_v39 = vshll.u32 %v227_v37, 23 }
 0x153   :  { %v229_v40 = vor.u32 4788187, %v228_v39  ;;  %v232_v42 = vcvt.s32.f32 %v225_v38 }
 0x155   :  { %v230_v41 = vand.u32 2147483647, %v229_v40 }
 0x157   :  { %v233_v43 = vmul.f32 %v232_v42, %v230_v41 }
 0x159   :  { %v234_v45 = vxor.u32 2147483648, %v233_v43 }
 0x15b   :  { %v235_v46 = vsel %vm152_vm9, %v234_v45, %v233_v43 }
 0x15c   :  { %v238_v48 = vsel %vm151_vm10, %v655_v29, %v235_v46 }
 0x15d   :  { %466 = vcosq.f32 %v238_v48 }
 0x15e   :  { %468 = vsinq.f32 %v238_v48 }
 0x167   :  { %v467_v52 = vpop.eup %466 }
 0x168   :  { %v469_v53 = vpop.eup %468  ;;  %v250_v54 = vxor.u32 2147483648, %v467_v52 }
 0x169   :  { %v247_v55 = vxor.u32 2147483648, %v469_v53 }
 0x16a   :  { %v251_v56 = vsel %vm249_vm11, %v250_v54, %v469_v53 }
 0x16b   :  { %v248_v57 = vsel %vm246_vm12, %v467_v52, %v247_v55 }
 0x16c   :  { %v252_v35 = vsel %vm245_vm13, %v248_v57, %v251_v56 }
 0x16d   :  { %v253_v58 = vsel %vm242_vm14, nan, %v252_v35 }
 0x16e   :  { %421 = vmatmul.mubr.msk.f32.vlgmr.msra.gmra.mrb[0].mxu1 %vm76_vm1, %v253_v58 }
 0x241   :  { %v338_v60 = vpop.f32.mrb[0].mxu1 }
 0x242   :  { %v339_v61 = vadd.f32 %v365_v59, %v338_v60  ;;  %v422_v62 = vpop.f32.mrb[1].mxu1 }
 0x244   :  { %342 = vst.msk [vmem:[#allocation8] sm:$0xff] %vm76_vm1, %v339_v61 }
 0x245   :  { %547 = shalt.err (!%p544_p0)
}
 0x246   :  { %s548_s11 = scalar_lea.hbm %s698_s5, 128 }
 0x247   :  { %p549_p1 = scmp.ne.s32.totalorder %s698_s5, %s548_s11  ;;  %p552_p2 = scmp.lt.u32.totalorder %s548_s11, %s698_s5 }
 0x249   :  { %p554_p3 = pnand %p552_p2, %p549_p1 }
 0x24b   :  { %557 = shalt.err (!%p554_p3)
}
 0x24c   :  { %352 = dma.vmem_to_hbm [thread:$0]  %s350_s7, 128, %s698_s5, [#allocation4]  }
 0x24d   :  { %562 = dma.done.wait [#allocation4], 128  }
 0x24e   :  { %563 = vsyncadd [#allocation4], 4294967168 }
 0x24f   :  { %356 = vsyncpa [#allocation3], 1 }
 0x250   :  { %357 = vsyncpa [#allocation6], 1 }
 0x251   :  { %358 = vsyncpa [#allocation4], 1 }

</bundles_post_ra>
